<compile_context>
chip_gen: v5e
topology: v5e:2x2
jax: 0.10.0
libtpu: 0.0.40
codegen_flags: <defaults>
</compile_context>

<pallas_src>
import functools
import math

import jax
import jax.numpy as jnp
from jax.experimental import pallas as pl
from jax.experimental.pallas import tpu as pltpu


def _attention_kernel(x_ref, wq_ref, wk_ref, o_ref, *, head_num, atten_dim,
                      compute_dtype):
    # x_ref  : (Bt, L, D)  f32  block (Bt batch rows per grid step)
    # wq_ref : (D, D)      bf16 full W_Q^T (in-dim major -> matmul is x @ W)
    # wk_ref : (D, D)      bf16 full W_K^T
    # o_ref  : (Bt, L, L)  f32  mean-over-heads attention probabilities
    bt, L, D = x_ref.shape
    scale = 1.0 / math.sqrt(atten_dim)

    # Merge batch & sequence rows into a single MXU M dimension for projections.
    x2 = x_ref[...].reshape(bt * L, D).astype(compute_dtype)
    q = jnp.dot(x2, wq_ref[...], preferred_element_type=jnp.float32)  # (Bt*L, D)
    k = jnp.dot(x2, wk_ref[...], preferred_element_type=jnp.float32)  # (Bt*L, D)

    # Fold the 1/sqrt(dh) scale into Q (cheaper than scaling (L, L) scores),
    # then drop Q, K to bf16 for the score matmuls (f32 accumulation below).
    q = (q * scale).reshape(bt, L, D).astype(compute_dtype)
    k = k.reshape(bt, L, D).astype(compute_dtype)

    acc = jnp.zeros((bt, L, L), dtype=jnp.float32)
    # Heads as a static (unrolled) loop axis; each head is one batched
    # last-dim contraction -> no explicit K^T.
    # TODO(synk): for large head counts use lax.fori_loop(..., unroll=True).
    for h in range(head_num):
        qh = q[:, :, h * atten_dim:(h + 1) * atten_dim]           # (Bt, L, dh)
        kh = k[:, :, h * atten_dim:(h + 1) * atten_dim]           # (Bt, L, dh)
        s = jnp.einsum("bqd,bkd->bqk", qh, kh,
                       preferred_element_type=jnp.float32)        # (Bt, L, L)
        # Numerically-stable softmax computed in place of s (fewer live (L,L)
        # temporaries); math stays f32.
        s = jnp.exp(s - jnp.max(s, axis=-1, keepdims=True))
        # Fold the mean over heads into the normalizer; reciprocal runs on the
        # otherwise-idle EUP slot instead of a VALU divide.
        denom = jnp.sum(s, axis=-1, keepdims=True) * head_num     # (Bt, L, 1)
        acc = acc + s * pl.reciprocal(denom, approx=True)
    o_ref[...] = acc


def _pick_batch_tile(batch, seq_len):
    """Largest divisor of `batch` keeping ~<=128 projection rows per grid step."""
    target = max(1, 128 // max(seq_len, 1))
    bt = 1
    for cand in range(1, min(batch, target) + 1):
        if batch % cand == 0:
            bt = cand
    return bt


def attention_pallas(x, w_q, w_k, head_num, *, batch_tile=None,
                     compute_dtype=jnp.bfloat16):
    """x: (B, L, D) f32; w_q, w_k: (D, D) in PyTorch nn.Linear layout (out, in)."""
    B, L, D = x.shape
    atten_dim = D // head_num
    if batch_tile is None:
        batch_tile = _pick_batch_tile(B, L)
    assert B % batch_tile == 0, (B, batch_tile)

    # Glue (not the hot path): transpose Linear weights to (in, out) and cast
    # to bf16 (half DMA bytes, 2x MXU throughput; f32 accumulation in-kernel).
    wq_t = jnp.asarray(w_q).T.astype(compute_dtype)
    wk_t = jnp.asarray(w_k).T.astype(compute_dtype)
    x = jnp.asarray(x, dtype=jnp.float32)

    kernel = functools.partial(_attention_kernel, head_num=head_num,
                               atten_dim=atten_dim, compute_dtype=compute_dtype)

    # Advisory cost estimate so XLA can schedule surrounding ops around the call.
    flops = 2 * 2 * B * L * D * D + 2 * B * head_num * L * L * atten_dim
    transcendentals = B * head_num * L * L                     # exp
    bytes_accessed = 4 * B * L * D + 2 * 2 * D * D + 4 * B * L * L
    cost = pl.CostEstimate(flops=flops, transcendentals=transcendentals,
                           bytes_accessed=bytes_accessed)

    return pl.pallas_call(
        kernel,
        out_shape=jax.ShapeDtypeStruct((B, L, L), jnp.float32),
        grid_spec=pltpu.PrefetchScalarGridSpec(
            num_scalar_prefetch=0,
            grid=(B // batch_tile,),
            in_specs=[
                pl.BlockSpec((batch_tile, L, D), lambda b: (b, 0, 0)),  # x tile
                pl.BlockSpec((D, D), lambda b: (0, 0)),                 # W_Q^T
                pl.BlockSpec((D, D), lambda b: (0, 0)),                 # W_K^T
            ],
            out_specs=pl.BlockSpec((batch_tile, L, L), lambda b: (b, 0, 0)),
        ),
        compiler_params=pltpu.CompilerParams(
            dimension_semantics=("parallel",),
            vmem_limit_bytes=64 * 1024 * 1024,
        ),
        cost_estimate=cost,
    )(x, wq_t, wk_t)


def attention_ref(x, w_q, w_k, head_num):
    """Pure-JAX f32 reference mirroring the PyTorch forward."""
    B, L, D = x.shape
    dh = D // head_num
    q = jnp.einsum("bld,ed->ble", x, w_q).reshape(B, L, head_num, dh).transpose(0, 2, 1, 3)
    k = jnp.einsum("bld,ed->ble", x, w_k).reshape(B, L, head_num, dh).transpose(0, 2, 1, 3)
    scores = jnp.einsum("bhld,bhmd->bhlm", q, k) / jnp.sqrt(jnp.float32(dh))
    atten = jax.nn.softmax(scores, axis=-1)
    return jnp.mean(atten, axis=1)


if __name__ == "__main__":
    # Small shapes consistent with the module: B=2, L=8, model_dim=32, heads=4.
    B, L, D, H = 2, 8, 32, 4
    key = jax.random.PRNGKey(0)
    kx, kq, kk = jax.random.split(key, 3)

    x = jax.random.normal(kx, (B, L, D), dtype=jnp.float32)
    # nn.Linear weights are (out_features, in_features).
    bound = 1.0 / math.sqrt(D)
    w_q = jax.random.uniform(kq, (D, D), minval=-bound, maxval=bound, dtype=jnp.float32)
    w_k = jax.random.uniform(kk, (D, D), minval=-bound, maxval=bound, dtype=jnp.float32)

    out = attention_pallas(x, w_q, w_k, H)
    out = jax.block_until_ready(out)

    ref = attention_ref(x, w_q, w_k, H)
    assert out.shape == (B, L, L), out.shape
    # bf16 MXU operands + approximate EUP reciprocal => loosened tolerance vs f32.
    max_err = float(jnp.max(jnp.abs(out - ref)))
    assert max_err < 2e-2, max_err

    print("KERNEL_OK")
</pallas_src>

<mosaic_0001>
module attributes {stable_mosaic.version = 11 : i64} {
  func.func @_attention_kernel(%arg0: i32, %arg1: memref<2x8x32xf32, #tpu.memory_space<vmem>>, %arg2: memref<32x32xbf16, #tpu.memory_space<vmem>>, %arg3: memref<32x32xbf16, #tpu.memory_space<vmem>>, %arg4: memref<2x8x8xf32, #tpu.memory_space<vmem>>) attributes {dimension_semantics = [#tpu.dimension_semantics<parallel>], iteration_bounds = array<i64: 1>, scalar_prefetch = 0 : i64, scratch_operands = 0 : i64, tpu.core_type = #tpu.core_type<tc>, window_params = [{transform_indices = @transform_0, window_bounds = array<i64: 2, 8, 32>}, {pipeline_mode = #tpu.pipeline_mode<synchronous>, transform_indices = @transform_1, window_bounds = array<i64: 32, 32>}, {pipeline_mode = #tpu.pipeline_mode<synchronous>, transform_indices = @transform_2, window_bounds = array<i64: 32, 32>}, {transform_indices = @transform_3, window_bounds = array<i64: 2, 8, 8>}]} {
    %c0 = arith.constant 0 : index
    %c0_0 = arith.constant 0 : index
    %c0_1 = arith.constant 0 : index
    %0 = vector.load %arg1[%c0, %c0_0, %c0_1] : memref<2x8x32xf32, #tpu.memory_space<vmem>>, vector<2x8x32xf32>
    %1 = vector.shape_cast %0 : vector<2x8x32xf32> to vector<16x32xf32>
    %2 = arith.truncf %1 : vector<16x32xf32> to vector<16x32xbf16>
    %c0_2 = arith.constant 0 : index
    %c0_3 = arith.constant 0 : index
    %3 = vector.load %arg2[%c0_2, %c0_3] : memref<32x32xbf16, #tpu.memory_space<vmem>>, vector<32x32xbf16>
    %cst = arith.constant dense<0.000000e+00> : vector<16x32xf32>
    %4 = tpu.matmul %2, %3, %cst {dimension_numbers = #tpu.dot_dimension_numbers<[1], [0], [0], [1], [0, 0, 1, 1], [], []>} : vector<16x32xbf16>, vector<32x32xbf16>, vector<16x32xf32> -> vector<16x32xf32>
    %c0_4 = arith.constant 0 : index
    %c0_5 = arith.constant 0 : index
    %5 = vector.load %arg3[%c0_4, %c0_5] : memref<32x32xbf16, #tpu.memory_space<vmem>>, vector<32x32xbf16>
    %cst_6 = arith.constant dense<0.000000e+00> : vector<16x32xf32>
    %6 = tpu.matmul %2, %5, %cst_6 {dimension_numbers = #tpu.dot_dimension_numbers<[1], [0], [0], [1], [0, 0, 1, 1], [], []>} : vector<16x32xbf16>, vector<32x32xbf16>, vector<16x32xf32> -> vector<16x32xf32>
    %cst_7 = arith.constant 0.353553385 : f32
    %7 = vector.broadcast %cst_7 : f32 to vector<16x32xf32>
    %8 = arith.mulf %4, %7 : vector<16x32xf32>
    %9 = vector.shape_cast %8 : vector<16x32xf32> to vector<2x8x32xf32>
    %10 = arith.truncf %9 : vector<2x8x32xf32> to vector<2x8x32xbf16>
    %11 = vector.shape_cast %6 : vector<16x32xf32> to vector<2x8x32xf32>
    %12 = arith.truncf %11 : vector<2x8x32xf32> to vector<2x8x32xbf16>
    %cst_8 = arith.constant 0.000000e+00 : f32
    %13 = vector.broadcast %cst_8 : f32 to vector<2x8x8xf32>
    %14 = vector.extract_strided_slice %10 {offsets = [0, 0, 0], sizes = [2, 8, 8], strides = [1, 1, 1]} : vector<2x8x32xbf16> to vector<2x8x8xbf16>
    %15 = vector.extract_strided_slice %12 {offsets = [0, 0, 0], sizes = [2, 8, 8], strides = [1, 1, 1]} : vector<2x8x32xbf16> to vector<2x8x8xbf16>
    "tpu.trace_start"() <{level = 10 : i32, message = "bqd,bkd->bqk"}> : () -> ()
    %cst_9 = arith.constant dense<0.000000e+00> : vector<2x8x8xf32>
    %16 = tpu.matmul %14, %15, %cst_9 {dimension_numbers = #tpu.dot_dimension_numbers<[2], [2], [1], [1], [0, 0, 0, 1, 1, 1], [0], [0]>} : vector<2x8x8xbf16>, vector<2x8x8xbf16>, vector<2x8x8xf32> -> vector<2x8x8xf32>
    "tpu.trace_stop"() : () -> ()
    %cst_10 = arith.constant dense<0xFF800000> : vector<2x8xf32>
    %17 = vector.multi_reduction <maximumf>, %16, %cst_10 [2] : vector<2x8x8xf32> to vector<2x8xf32>
    %18 = vector.shape_cast %17 : vector<2x8xf32> to vector<2x8x1xf32>
    %19 = vector.broadcast %18 : vector<2x8x1xf32> to vector<2x8x8xf32>
    %20 = arith.subf %16, %19 : vector<2x8x8xf32>
    %21 = math.exp %20 : vector<2x8x8xf32>
    %cst_11 = arith.constant dense<0.000000e+00> : vector<2x8xf32>
    %22 = vector.multi_reduction <add>, %21, %cst_11 [2] : vector<2x8x8xf32> to vector<2x8xf32>
    %23 = vector.shape_cast %22 : vector<2x8xf32> to vector<2x8x1xf32>
    %cst_12 = arith.constant 4.000000e+00 : f32
    %24 = vector.broadcast %cst_12 : f32 to vector<2x8x1xf32>
    %25 = arith.mulf %23, %24 : vector<2x8x1xf32>
    %26 = tpu.reciprocal %25 {approx = true} : vector<2x8x1xf32> -> vector<2x8x1xf32>
    %27 = vector.broadcast %26 : vector<2x8x1xf32> to vector<2x8x8xf32>
    %28 = arith.mulf %21, %27 : vector<2x8x8xf32>
    %29 = arith.addf %13, %28 : vector<2x8x8xf32>
    %30 = vector.extract_strided_slice %10 {offsets = [0, 0, 8], sizes = [2, 8, 8], strides = [1, 1, 1]} : vector<2x8x32xbf16> to vector<2x8x8xbf16>
    %31 = vector.extract_strided_slice %12 {offsets = [0, 0, 8], sizes = [2, 8, 8], strides = [1, 1, 1]} : vector<2x8x32xbf16> to vector<2x8x8xbf16>
    "tpu.trace_start"() <{level = 10 : i32, message = "bqd,bkd->bqk"}> : () -> ()
    %cst_13 = arith.constant dense<0.000000e+00> : vector<2x8x8xf32>
    %32 = tpu.matmul %30, %31, %cst_13 {dimension_numbers = #tpu.dot_dimension_numbers<[2], [2], [1], [1], [0, 0, 0, 1, 1, 1], [0], [0]>} : vector<2x8x8xbf16>, vector<2x8x8xbf16>, vector<2x8x8xf32> -> vector<2x8x8xf32>
    "tpu.trace_stop"() : () -> ()
    %cst_14 = arith.constant dense<0xFF800000> : vector<2x8xf32>
    %33 = vector.multi_reduction <maximumf>, %32, %cst_14 [2] : vector<2x8x8xf32> to vector<2x8xf32>
    %34 = vector.shape_cast %33 : vector<2x8xf32> to vector<2x8x1xf32>
    %35 = vector.broadcast %34 : vector<2x8x1xf32> to vector<2x8x8xf32>
    %36 = arith.subf %32, %35 : vector<2x8x8xf32>
    %37 = math.exp %36 : vector<2x8x8xf32>
    %cst_15 = arith.constant dense<0.000000e+00> : vector<2x8xf32>
    %38 = vector.multi_reduction <add>, %37, %cst_15 [2] : vector<2x8x8xf32> to vector<2x8xf32>
    %39 = vector.shape_cast %38 : vector<2x8xf32> to vector<2x8x1xf32>
    %cst_16 = arith.constant 4.000000e+00 : f32
    %40 = vector.broadcast %cst_16 : f32 to vector<2x8x1xf32>
    %41 = arith.mulf %39, %40 : vector<2x8x1xf32>
    %42 = tpu.reciprocal %41 {approx = true} : vector<2x8x1xf32> -> vector<2x8x1xf32>
    %43 = vector.broadcast %42 : vector<2x8x1xf32> to vector<2x8x8xf32>
    %44 = arith.mulf %37, %43 : vector<2x8x8xf32>
    %45 = arith.addf %29, %44 : vector<2x8x8xf32>
    %46 = vector.extract_strided_slice %10 {offsets = [0, 0, 16], sizes = [2, 8, 8], strides = [1, 1, 1]} : vector<2x8x32xbf16> to vector<2x8x8xbf16>
    %47 = vector.extract_strided_slice %12 {offsets = [0, 0, 16], sizes = [2, 8, 8], strides = [1, 1, 1]} : vector<2x8x32xbf16> to vector<2x8x8xbf16>
    "tpu.trace_start"() <{level = 10 : i32, message = "bqd,bkd->bqk"}> : () -> ()
    %cst_17 = arith.constant dense<0.000000e+00> : vector<2x8x8xf32>
    %48 = tpu.matmul %46, %47, %cst_17 {dimension_numbers = #tpu.dot_dimension_numbers<[2], [2], [1], [1], [0, 0, 0, 1, 1, 1], [0], [0]>} : vector<2x8x8xbf16>, vector<2x8x8xbf16>, vector<2x8x8xf32> -> vector<2x8x8xf32>
    "tpu.trace_stop"() : () -> ()
    %cst_18 = arith.constant dense<0xFF800000> : vector<2x8xf32>
    %49 = vector.multi_reduction <maximumf>, %48, %cst_18 [2] : vector<2x8x8xf32> to vector<2x8xf32>
    %50 = vector.shape_cast %49 : vector<2x8xf32> to vector<2x8x1xf32>
    %51 = vector.broadcast %50 : vector<2x8x1xf32> to vector<2x8x8xf32>
    %52 = arith.subf %48, %51 : vector<2x8x8xf32>
    %53 = math.exp %52 : vector<2x8x8xf32>
    %cst_19 = arith.constant dense<0.000000e+00> : vector<2x8xf32>
    %54 = vector.multi_reduction <add>, %53, %cst_19 [2] : vector<2x8x8xf32> to vector<2x8xf32>
    %55 = vector.shape_cast %54 : vector<2x8xf32> to vector<2x8x1xf32>
    %cst_20 = arith.constant 4.000000e+00 : f32
    %56 = vector.broadcast %cst_20 : f32 to vector<2x8x1xf32>
    %57 = arith.mulf %55, %56 : vector<2x8x1xf32>
    %58 = tpu.reciprocal %57 {approx = true} : vector<2x8x1xf32> -> vector<2x8x1xf32>
    %59 = vector.broadcast %58 : vector<2x8x1xf32> to vector<2x8x8xf32>
    %60 = arith.mulf %53, %59 : vector<2x8x8xf32>
    %61 = arith.addf %45, %60 : vector<2x8x8xf32>
    %62 = vector.extract_strided_slice %10 {offsets = [0, 0, 24], sizes = [2, 8, 8], strides = [1, 1, 1]} : vector<2x8x32xbf16> to vector<2x8x8xbf16>
    %63 = vector.extract_strided_slice %12 {offsets = [0, 0, 24], sizes = [2, 8, 8], strides = [1, 1, 1]} : vector<2x8x32xbf16> to vector<2x8x8xbf16>
    "tpu.trace_start"() <{level = 10 : i32, message = "bqd,bkd->bqk"}> : () -> ()
    %cst_21 = arith.constant dense<0.000000e+00> : vector<2x8x8xf32>
    %64 = tpu.matmul %62, %63, %cst_21 {dimension_numbers = #tpu.dot_dimension_numbers<[2], [2], [1], [1], [0, 0, 0, 1, 1, 1], [0], [0]>} : vector<2x8x8xbf16>, vector<2x8x8xbf16>, vector<2x8x8xf32> -> vector<2x8x8xf32>
    "tpu.trace_stop"() : () -> ()
    %cst_22 = arith.constant dense<0xFF800000> : vector<2x8xf32>
    %65 = vector.multi_reduction <maximumf>, %64, %cst_22 [2] : vector<2x8x8xf32> to vector<2x8xf32>
    %66 = vector.shape_cast %65 : vector<2x8xf32> to vector<2x8x1xf32>
    %67 = vector.broadcast %66 : vector<2x8x1xf32> to vector<2x8x8xf32>
    %68 = arith.subf %64, %67 : vector<2x8x8xf32>
    %69 = math.exp %68 : vector<2x8x8xf32>
    %cst_23 = arith.constant dense<0.000000e+00> : vector<2x8xf32>
    %70 = vector.multi_reduction <add>, %69, %cst_23 [2] : vector<2x8x8xf32> to vector<2x8xf32>
    %71 = vector.shape_cast %70 : vector<2x8xf32> to vector<2x8x1xf32>
    %cst_24 = arith.constant 4.000000e+00 : f32
    %72 = vector.broadcast %cst_24 : f32 to vector<2x8x1xf32>
    %73 = arith.mulf %71, %72 : vector<2x8x1xf32>
    %74 = tpu.reciprocal %73 {approx = true} : vector<2x8x1xf32> -> vector<2x8x1xf32>
    %75 = vector.broadcast %74 : vector<2x8x1xf32> to vector<2x8x8xf32>
    %76 = arith.mulf %69, %75 : vector<2x8x8xf32>
    %77 = arith.addf %61, %76 : vector<2x8x8xf32>
    %c0_25 = arith.constant 0 : index
    %c0_26 = arith.constant 0 : index
    %c0_27 = arith.constant 0 : index
    %78 = vector.load %arg4[%c0_25, %c0_26, %c0_27] : memref<2x8x8xf32, #tpu.memory_space<vmem>>, vector<2x8x8xf32>
    tpu.vector_store %arg4[%c0_25, %c0_26, %c0_27], %77 {strides = array<i32>} : memref<2x8x8xf32, #tpu.memory_space<vmem>>, vector<2x8x8xf32>,
    return
  }
  func.func @transform_0(%arg0: i32) -> (i32, i32, i32) {
    %c0_i32 = arith.constant 0 : i32
    %c0_i32_0 = arith.constant 0 : i32
    %c0_i32_1 = arith.constant 0 : i32
    return %arg0, %c0_i32, %c0_i32_0 : i32, i32, i32
  }
  func.func @transform_1(%arg0: i32) -> (i32, i32) {
    %c0_i32 = arith.constant 0 : i32
    %c0_i32_0 = arith.constant 0 : i32
    %c0_i32_1 = arith.constant 0 : i32
    return %c0_i32, %c0_i32_0 : i32, i32
  }
  func.func @transform_2(%arg0: i32) -> (i32, i32) {
    %c0_i32 = arith.constant 0 : i32
    %c0_i32_0 = arith.constant 0 : i32
    %c0_i32_1 = arith.constant 0 : i32
    return %c0_i32, %c0_i32_0 : i32, i32
  }
  func.func @transform_3(%arg0: i32) -> (i32, i32, i32) {
    %c0_i32 = arith.constant 0 : i32
    %c0_i32_0 = arith.constant 0 : i32
    %c0_i32_1 = arith.constant 0 : i32
    return %arg0, %c0_i32, %c0_i32_0 : i32, i32, i32
  }
}

</mosaic_0001>

<bundles_post_ra>
// kernel: tpu_custom_call.1
= control target key start
LH: loop header
LB: loop body
LE: loop exit
PB: predicated region body
PF: predicated region fallthrough
CT: control target
= control target key end

     0   :  { %8 = vsyncpa [#allocation3], 0  ;;  %s717_s0 = inlined_call_operand.hbm [shape: f32[2,8,32], index: 0, kind: input, shape index: {}]   ;;  %s718_s1 = inlined_call_operand.hbm [shape: bf16[32,32], index: 1, kind: input, shape index: {}]   ;;  %s719_s2 = inlined_call_operand.hbm [shape: bf16[32,32], index: 2, kind: input, shape index: {}]   ;;  %s720_s3 = inlined_call_operand.hbm [shape: f32[2,8,8], index: 3, kind: output, shape index: {}]  }
   0x1   :  { %9 = vsyncpa [#allocation6], 0  ;;  %s28_s14 = sshll.u32 %s718_s1, 4  ;;  %s29_s14 = int_to_ptr.hbm [resolvable:$true] %s28_s14 }
   0x2   :  { %10 = vsyncpa [#allocation4], 0  ;;  %s626_s15 = smov [#allocation5]   ;;  %s15_s19 = sshll.u32 %s717_s0, 4  ;;  %s16_s19 = int_to_ptr.hbm [resolvable:$true] %s15_s19 }
   0x3   :  { %s30_s16 = sshll.u32 %s626_s15, 4  ;;  %s627_s20 = smov 64   ;;  %s31_s16 = int_to_ptr.vmem [resolvable:$true] %s30_s16 }
   0x4   :  { %s628_s21 = smov 4   ;;  %s629_s22 = smov [#allocation2]  }
   0x5   :  { %36 = dma.hbm_to_vmem [thread:$0]  %s29_s14, 256, %s31_s16, [#allocation6], %s627_s20, %s627_s20, %s628_s21  }
   0x6   :  { %s17_s23 = sshll.u32 %s629_s22, 4  ;;  %s630_s24 = smov 128   ;;  %s18_s23 = int_to_ptr.vmem [resolvable:$true] %s17_s23 }
   0x7   :  { %s631_s25 = smov 8   ;;  %s41_s27 = sshll.u32 %s719_s2, 4  ;;  %s42_s27 = int_to_ptr.hbm [resolvable:$true] %s41_s27 }
   0x8   :  { %23 = dma.hbm_to_vmem [thread:$0]  %s16_s19, 256, %s18_s23, [#allocation3], %s630_s24, %s630_s24, %s631_s25  }
   0x9   :  { %s632_s28 = smov [#allocation7]  }
   0xa   :  { %s43_s0 = sshll.u32 %s632_s28, 4  ;;  %s44_s0 = int_to_ptr.vmem [resolvable:$true] %s43_s0 }
   0xb   :  { %49 = dma.hbm_to_vmem [thread:$0]  %s42_s27, 256, %s44_s0, [#allocation6], %s627_s20, %s627_s20, %s628_s21  }
   0xc   :  { %620 = dma.done.wait [#allocation3], 256  }
   0xd   :  { %621 = vsyncadd [#allocation3], 4294967040 }
   0xe   :  { %622 = dma.done.wait [#allocation6], 512  }
   0xf   :  { %623 = vsyncadd [#allocation6], 4294966784  ;;  %v478_v0 = vld [vmem:[#allocation5 + $0x8] sm:$0xff]  ;;  %v480_v1 = vld [vmem:[#allocation7 + $0x8] sm:$0xff]  ;;  %vm82_vm0 = vcmask 261120   ;;  %vm136_vm1 = vcmask 64512  }
  0x10   :  { %v477_v2 = vld [vmem:[#allocation5] sm:$0xff]  ;;  %92 = vmatpush.bf16.msra.mxu0 %v478_v0  ;;  %122 = vmatpush.bf16.msra.mxu1 %v480_v1  ;;  %v479_v3 = vld [vmem:[#allocation7] sm:$0xff]  ;;  %v64_v5 = vld [vmem:[#allocation2 + $0x8] sm:$0xff]  ;;  %s633_s2 = smov 112   ;;  %s634_s29 = smov 120  }
  0x11   :  { %v63_v4 = vld [vmem:[#allocation2] sm:$0xff]  ;;  %s635_s30 = smov 104   ;;  %s636_s4 = smov [#allocation8]  }
  0x12   :  { %v65_v6 = vpack.c.bf16 %v64_v5, %v63_v4  ;;  %s435_s5 = sshll.u32 %s636_s4, 4  ;;  %s437_s8 = sshll.u32 %s720_s3, 4  ;;  %s436_s5 = int_to_ptr.vmem [resolvable:$true] %s435_s5  ;;  %s438_s8 = int_to_ptr.hbm [resolvable:$true] %s437_s8 }
  0x14   :  { %93 = vmatpush.bf16.msra.mxu0 %v477_v2  ;;  %123 = vmatpush.bf16.msra.mxu1 %v479_v3 }
  0x17   :  { %459 = vmatmul.msk.bf16.vlgmr.msra.gmra.mxu0 %vm82_vm0, %v65_v6  ;;  %468 = vmatmul.msk.bf16.vlgmr.msra.gmra.mxu1 %vm82_vm0, %v65_v6 }
  0x94   :  { %v95_v7 = vpop.f32.mrf.mxu0  ;;  %v125_v8 = vpop.f32.mrf.mxu1 }
  0x95   :  { %v130_v9 = vmul.f32 0.35355338, %v95_v7  ;;  %v134_v10 = vpack.c.bf16 %v125_v8, %v125_v8 }
  0x97   :  { %v132_v11 = vpack.c.bf16 %v130_v9, %v130_v9  ;;  %v207_v12 = vunpack.c.l.b16 %v134_v10  ;;  %v141_v13 = vsel %vm136_vm1, %v134_v10, 0 }
  0x98   :  { %150 = vmatpush.bf16.xpose.msra.mxu2 %v141_v13 }
  0x99   :  { %v202_v14 = vunpack.c.l.b16 %v132_v11  ;;  %v208_v15 = vpack.c.b16 %v207_v12, %v207_v12 }
  0x9b   :  { %v203_v16 = vpack.c.b16 %v202_v14, %v202_v14  ;;  %287 = vrot.lane.b32.xlu2 %v208_v15, %s633_s2  ;;  %209 = vrot.lane.b32.xlu0 %v208_v15, %s634_s29 }
  0x9c   :  { %v97_v17 = vpop.f32.mrf.mxu0  ;;  %v127_v18 = vpop.f32.mrf.mxu1 }
  0x9d   :  { %v131_v19 = vmul.f32 0.35355338, %v97_v17  ;;  %v135_v20 = vpack.c.bf16 %v127_v18, %v127_v18  ;;  %204 = vrot.lane.b32.xlu1 %v203_v16, %s634_s29 }
  0x9f   :  { %v133_v21 = vpack.c.bf16 %v131_v19, %v131_v19  ;;  %v236_v22 = vunpack.c.l.b16 %v135_v20  ;;  %469 = vmatmul.msk.bf16.vlgmr.msra.gmra.mxu2 %vm136_vm1, %v132_v11  ;;  %v160_v23 = vsel %vm136_vm1, %v135_v20, 0 }
  0xa0   :  { %169 = vmatpush.bf16.xpose.msra.mxu3 %v160_v23 }
  0xa1   :  { %v231_v24 = vunpack.c.l.b16 %v133_v21  ;;  %v237_v25 = vpack.c.b16 %v236_v22, %v236_v22 }
  0xa3   :  { %v232_v26 = vpack.c.b16 %v231_v24, %v231_v24  ;;  %310 = vrot.lane.b32.xlu2 %v237_v25, %s633_s2  ;;  %238 = vrot.lane.b32.xlu0 %v237_v25, %s634_s29 }
  0xa5   :  { %233 = vrot.lane.b32.xlu1 %v232_v26, %s634_s29 }
  0xa7   :  { %470 = vmatmul.msk.bf16.vlgmr.msra.gmra.mxu3 %vm136_vm1, %v133_v21 }
  0xab   :  { %359 = vrot.lane.b32.xlu2 %v208_v15, %s635_s30  ;;  %285 = vrot.lane.b32.xlu0 %v203_v16, %s633_s2 }
  0xad   :  { %308 = vrot.lane.b32.xlu1 %v232_v26, %s633_s2 }
  0xb3   :  { %382 = vrot.lane.b32.xlu0 %v237_v25, %s635_s30  ;;  %380 = vrot.lane.b32.xlu2 %v232_v26, %s635_s30 }
  0xb5   :  { %357 = vrot.lane.b32.xlu1 %v203_v16, %s635_s30 }
  0xf5   :  { %v288_v27 = vpop.permute.xlu2 %287 }
  0xf6   :  { %v293_v28 = vsel %vm136_vm1, %v288_v27, 0 }
  0xf7   :  { %302 = vmatpush.bf16.xpose.msrb.mxu2 %v293_v28 }
  0xfd   :  { %v311_v29 = vpop.permute.xlu2 %310 }
  0xfe   :  { %v316_v30 = vsel %vm136_vm1, %v311_v29, 0 }
  0xff   :  { %325 = vmatpush.bf16.xpose.msrb.mxu3 %v316_v30 }
 0x105   :  { %v360_v31 = vpop.permute.xlu2 %359 }
 0x106   :  { %v365_v34 = vsel %vm136_vm1, %v360_v31, 0 }
 0x10d   :  { %v210_v32 = vpop.permute.xlu0 %209  ;;  %v381_v49 = vpop.permute.xlu2 %380 }
 0x10e   :  { %v215_v33 = vsel %vm136_vm1, %v210_v32, 0 }
 0x10f   :  { %224 = vmatpush.bf16.xpose.msrb.mxu0 %v215_v33  ;;  %v205_v35 = vpop.permute.xlu1 %204 }
 0x115   :  { %v239_v36 = vpop.permute.xlu0 %238 }
 0x116   :  { %471 = vmatmul.msk.bf16.vlgmr.msrb.gmra.mxu0 %vm136_vm1, %v205_v35  ;;  %v244_v37 = vsel %vm136_vm1, %v239_v36, 0 }
 0x117   :  { %374 = vmatpush.bf16.xpose.msra.mxu0 %v365_v34  ;;  %253 = vmatpush.bf16.xpose.msrb.mxu1 %v244_v37  ;;  %v234_v38 = vpop.permute.xlu1 %233 }
 0x11d   :  { %v286_v39 = vpop.permute.xlu0 %285 }
 0x11e   :  { %472 = vmatmul.msk.bf16.vlgmr.msrb.gmra.mxu1 %vm136_vm1, %v234_v38  ;;  %473 = vmatmul.msk.bf16.vlgmr.msrb.gmra.mxu2 %vm136_vm1, %v286_v39 }
 0x11f   :  { %v309_v40 = vpop.permute.xlu1 %308 }
 0x120   :  { %474 = vmatmul.msk.bf16.vlgmr.msrb.gmra.mxu3 %vm136_vm1, %v309_v40 }
 0x122   :  { %v152_v41 = vpop.f32.mrf.mxu2 }
 0x123   :  { %v175_v42 = vsel %vm136_vm1, %v152_v41, -inf }
 0x124   :  { %176 = vmax.xlane.f32.xlu0 %v175_v42 }
 0x125   :  { %v383_v43 = vpop.permute.xlu0 %382 }
 0x126   :  { %v388_v44 = vsel %vm136_vm1, %v383_v43, 0 }
 0x127   :  { %397 = vmatpush.bf16.xpose.msra.mxu1 %v388_v44  ;;  %v358_v45 = vpop.permute.xlu1 %357 }
 0x128   :  { %475 = vmatmul.msk.bf16.vlgmr.msra.gmra.mxu0 %vm136_vm1, %v358_v45 }
 0x12a   :  { %v154_v46 = vpop.f32.mrf.mxu2  ;;  %v171_v47 = vpop.f32.mrf.mxu3 }
 0x12b   :  { %v178_v48 = vsel %vm136_vm1, %v171_v47, -inf }
 0x12c   :  { %179 = vmax.xlane.f32.xlu1 %v178_v48 }
 0x12e   :  { %476 = vmatmul.msk.bf16.vlgmr.msra.gmra.mxu1 %vm136_vm1, %v381_v49 }
 0x132   :  { %v173_v50 = vpop.f32.mrf.mxu3 }
 0x193   :  { %v226_v51 = vpop.f32.mrf.mxu0 }
 0x194   :  { %v259_v52 = vsel %vm136_vm1, %v226_v51, -inf }
 0x195   :  { %260 = vmax.xlane.f32.xlu2 %v259_v52 }
 0x197   :  { %v177_v53 = vpop.xlane.xlu0 %176 }
 0x198   :  { %v181_v54 = vsub.f32 %v152_v41, %v177_v53 }
 0x19a   :  { %v183_v58 = vmul.f32 1.442695, %v181_v54 }
 0x19b   :  { %v228_v55 = vpop.f32.mrf.mxu0  ;;  %v255_v56 = vpop.f32.mrf.mxu1 }
 0x19c   :  { %v262_v57 = vsel %vm136_vm1, %v255_v56, -inf  ;;  %492 = vpow2.f32 %v183_v58 }
 0x19d   :  { %263 = vmax.xlane.f32.xlu2 %v262_v57 }
 0x19f   :  { %v180_v59 = vpop.xlane.xlu1 %179 }
 0x1a0   :  { %v182_v60 = vsub.f32 %v171_v47, %v180_v59 }
 0x1a1   :  { %v304_v61 = vpop.f32.mrf.mxu2 }
 0x1a2   :  { %v185_v62 = vmul.f32 1.442695, %v182_v60  ;;  %v331_v63 = vsel %vm136_vm1, %v304_v61, -inf  ;;  %v692_v5 = vpop.eup %492 }
 0x1a3   :  { %332 = vmax.xlane.f32.xlu0 %v331_v63  ;;  %v257_v0 = vpop.f32.mrf.mxu1  ;;  %v327_v1 = vpop.f32.mrf.mxu3  ;;  %v187_v11 = vsel %vm136_vm1, %v692_v5, 0.0 }
 0x1a4   :  { %v334_v2 = vsel %vm136_vm1, %v327_v1, -inf  ;;  %494 = vpow2.f32 %v185_v62 }
 0x1a5   :  { %v376_v3 = vpop.f32.mrf.mxu0  ;;  %335 = vmax.xlane.f32.xlu1 %v334_v2 }
 0x1a6   :  { %v403_v4 = vsel %vm136_vm1, %v376_v3, -inf }
 0x1a7   :  { %404 = vmax.xlane.f32.xlu2 %v403_v4 }
 0x1a9   :  { %v306_v6 = vpop.f32.mrf.mxu2 }
 0x1aa   :  { %v694_v7 = vpop.eup %494 }
 0x1ab   :  { %v329_v8 = vpop.f32.mrf.mxu3  ;;  %v399_v9 = vpop.f32.mrf.mxu1  ;;  %v190_v13 = vsel %vm136_vm1, %v694_v7, 0.0 }
 0x1ac   :  { %v406_v10 = vsel %vm136_vm1, %v399_v9, -inf }
 0x1ad   :  { %407 = vmax.xlane.f32.xlu0 %v406_v10  ;;  %v378_v12 = vpop.f32.mrf.mxu0  ;;  %188 = vadd.xlane.f32.xlu1 %v187_v11 }
 0x1af   :  { %191 = vadd.xlane.f32.xlu2 %v190_v13 }
 0x1b3   :  { %v401_v14 = vpop.f32.mrf.mxu1 }
 0x208   :  { %v261_v15 = vpop.xlane.xlu2 %260 }
 0x209   :  { %v265_v16 = vsub.f32 %v226_v51, %v261_v15 }
 0x20b   :  { %v267_v17 = vmul.f32 1.442695, %v265_v16 }
 0x20d   :  { %496 = vpow2.f32 %v267_v17 }
 0x210   :  { %v264_v18 = vpop.xlane.xlu2 %263 }
 0x211   :  { %v266_v19 = vsub.f32 %v255_v56, %v264_v18 }
 0x213   :  { %v497_v20 = vpop.eup %496  ;;  %v269_v21 = vmul.f32 1.442695, %v266_v19 }
 0x214   :  { %v271_v22 = vsel %vm136_vm1, %v497_v20, 0.0 }
 0x215   :  { %498 = vpow2.f32 %v269_v21  ;;  %272 = vadd.xlane.f32.xlu0 %v271_v22 }
 0x216   :  { %v333_v23 = vpop.xlane.xlu0 %332 }
 0x217   :  { %v337_v24 = vsub.f32 %v304_v61, %v333_v23 }
 0x218   :  { %v336_v25 = vpop.xlane.xlu1 %335 }
 0x219   :  { %v339_v26 = vmul.f32 1.442695, %v337_v24  ;;  %v338_v27 = vsub.f32 %v327_v1, %v336_v25 }
 0x21a   :  { %v405_v28 = vpop.xlane.xlu2 %404 }
 0x21b   :  { %v499_v29 = vpop.eup %498  ;;  %500 = vpow2.f32 %v339_v26  ;;  %v341_v30 = vmul.f32 1.442695, %v338_v27  ;;  %v409_v31 = vsub.f32 %v376_v3, %v405_v28 }
 0x21c   :  { %v274_v32 = vsel %vm136_vm1, %v499_v29, 0.0 }
 0x21d   :  { %502 = vpow2.f32 %v341_v30  ;;  %v411_v33 = vmul.f32 1.442695, %v409_v31  ;;  %275 = vadd.xlane.f32.xlu1 %v274_v32 }
 0x21f   :  { %504 = vpow2.f32 %v411_v33 }
 0x220   :  { %v408_v34 = vpop.xlane.xlu0 %407  ;;  %v189_v45 = vpop.xlane.xlu1 %188 }
 0x221   :  { %v501_v35 = vpop.eup %500  ;;  %v410_v36 = vsub.f32 %v399_v9, %v408_v34  ;;  %v193_v50 = vmul.f32 4.0, %v189_v45 }
 0x222   :  { %v343_v37 = vsel %vm136_vm1, %v501_v35, 0.0  ;;  %v192_v46 = vpop.xlane.xlu2 %191 }
 0x223   :  { %v503_v38 = vpop.eup %502  ;;  %v413_v39 = vmul.f32 1.442695, %v410_v36  ;;  %344 = vadd.xlane.f32.xlu2 %v343_v37  ;;  %v194_v51 = vmul.f32 4.0, %v192_v46 }
 0x224   :  { %v346_v40 = vsel %vm136_vm1, %v503_v38, 0.0 }
 0x225   :  { %v505_v41 = vpop.eup %504  ;;  %506 = vpow2.f32 %v413_v39  ;;  %347 = vadd.xlane.f32.xlu0 %v346_v40 }
 0x226   :  { %v415_v42 = vsel %vm136_vm1, %v505_v41, 0.0 }
 0x227   :  { %416 = vadd.xlane.f32.xlu1 %v415_v42 }
 0x22b   :  { %v507_v43 = vpop.eup %506 }
 0x22c   :  { %v418_v44 = vsel %vm136_vm1, %v507_v43, 0.0 }
 0x22d   :  { %419 = vadd.xlane.f32.xlu2 %v418_v44 }
 0x288   :  { %v273_v47 = vpop.xlane.xlu0 %272 }
 0x289   :  { %v277_v48 = vmul.f32 4.0, %v273_v47 }
 0x28b   :  { %508 = vrcp.f32 %v277_v48 }
 0x28c   :  { %510 = vrcp.f32 %v193_v50 }
 0x290   :  { %v276_v49 = vpop.xlane.xlu1 %275 }
 0x291   :  { %v278_v53 = vmul.f32 4.0, %v276_v49  ;;  %v509_v58 = vpop.eup %508 }
 0x292   :  { %v511_v60 = vpop.eup %510  ;;  %v281_v61 = vmul.f32 %v509_v58, %v497_v20 }
 0x293   :  { %v197_v0 = vmul.f32 %v511_v60, %v692_v5 }
 0x295   :  { %v283_v8 = vadd.f32 %v281_v61, %v197_v0 }
 0x296   :  { %v345_v52 = vpop.xlane.xlu2 %344 }
 0x297   :  { %v349_v54 = vmul.f32 4.0, %v345_v52 }
 0x298   :  { %v348_v55 = vpop.xlane.xlu0 %347 }
 0x299   :  { %512 = vrcp.f32 %v349_v54  ;;  %v350_v56 = vmul.f32 4.0, %v348_v55 }
 0x29a   :  { %514 = vrcp.f32 %v194_v51  ;;  %v417_v57 = vpop.xlane.xlu1 %416 }
 0x29b   :  { %516 = vrcp.f32 %v278_v53  ;;  %v421_v59 = vmul.f32 4.0, %v417_v57 }
 0x29c   :  { %518 = vrcp.f32 %v350_v56 }
 0x29d   :  { %520 = vrcp.f32 %v421_v59 }
 0x29f   :  { %v513_v62 = vpop.eup %512 }
 0x2a0   :  { %v515_v63 = vpop.eup %514  ;;  %v353_v1 = vmul.f32 %v513_v62, %v501_v35  ;;  %v420_v2 = vpop.xlane.xlu2 %419 }
 0x2a1   :  { %v517_v3 = vpop.eup %516  ;;  %v422_v4 = vmul.f32 4.0, %v420_v2  ;;  %v198_v13 = vmul.f32 %v515_v63, %v694_v7 }
 0x2a2   :  { %v519_v6 = vpop.eup %518  ;;  %v282_v10 = vmul.f32 %v517_v3, %v499_v29  ;;  %v355_v11 = vadd.f32 %v353_v1, %v283_v8 }
 0x2a3   :  { %v521_v9 = vpop.eup %520  ;;  %522 = vrcp.f32 %v422_v4  ;;  %v354_v14 = vmul.f32 %v519_v6, %v503_v38 }
 0x2a4   :  { %v425_v12 = vmul.f32 %v521_v9, %v505_v41  ;;  %v284_v16 = vadd.f32 %v282_v10, %v198_v13 }
 0x2a6   :  { %v427_v15 = vadd.f32 %v425_v12, %v355_v11  ;;  %v356_v5 = vadd.f32 %v354_v14, %v284_v16 }
 0x2a8   :  { %429 = vst.msk [vmem:[#allocation8] sm:$0xff] %vm136_vm1, %v427_v15 }
 0x2a9   :  { %v523_v17 = vpop.eup %522 }
 0x2aa   :  { %v426_v18 = vmul.f32 %v523_v17, %v507_v43 }
 0x2ac   :  { %v428_v19 = vadd.f32 %v426_v18, %v356_v5 }
 0x2ae   :  { %430 = vst.msk [vmem:[#allocation8 + $0x8] sm:$0xff] %vm136_vm1, %v428_v19 }
 0x2af   :  { %443 = dma.vmem_to_hbm [thread:$0]  %s436_s5, 256, %s438_s8, [#allocation4], %s630_s24, %s630_s24, %s631_s25  }
 0x2b0   :  { %624 = dma.done.wait [#allocation4], 256  }
 0x2b1   :  { %625 = vsyncadd [#allocation4], 4294967040 }
 0x2b2   :  { %448 = vsyncpa [#allocation3], 1 }
 0x2b3   :  { %449 = vsyncpa [#allocation6], 1 }
 0x2b4   :  { %450 = vsyncpa [#allocation4], 1 }

</bundles_post_ra>
